<compile_context>
chip_gen: v5e
topology: v5e:2x2
jax: 0.10.0
libtpu: 0.0.40
codegen_flags: <defaults>
</compile_context>

<pallas_src>
import functools

import jax
import jax.numpy as jnp
from jax.experimental import pallas as pl
from jax.experimental.pallas import tpu as pltpu

_LANE = 128
_TP_TARGET = 16384                   # pixel-tile target (lane axis), multiple of 128
_VMEM_LIMIT = 32 * 1024 * 1024       # safe on v5e/v6e/v7x; blocks here are small


def _round_up(x, m):
    return ((x + m - 1) // m) * m


def _pick_tile(hwp, max_tile=_TP_TARGET):
    """Largest 128-multiple divisor of hwp that is <= max_tile."""
    m = hwp // _LANE
    dmax = max(1, min(m, max_tile // _LANE))
    for d in range(dmax, 0, -1):
        if m % d == 0:
            return d * _LANE
    return _LANE


def _compute_heads(x, w, b):
    # x: (C, TP) f32, w: (4, C), b: (4, 1)  ->  heads (4, TP), lane-dense.
    c = x.shape[0]
    if c >= 32:
        # Deep feature maps: move the channel reduction onto the (idle) MXU.
        return jnp.dot(w, x, preferred_element_type=jnp.float32) + b
    # Small C: VPU broadcast-FMAs with two partial accumulators (breaks the
    # serially-dependent add chain).
    acc0 = w[:, 0:1] * x[0:1, :]
    acc1 = None
    for ci in range(1, c):
        term = w[:, ci:ci + 1] * x[ci:ci + 1, :]
        if ci % 2 == 0:
            acc0 = acc0 + term
        else:
            acc1 = term if acc1 is None else acc1 + term
    heads = acc0 if acc1 is None else acc0 + acc1
    return heads + b


# ----------------------------------------------------------------------------
# Kernel 1: forward-only head bank (used by forward / predict).
# ----------------------------------------------------------------------------
def _heads_kernel(x_ref, w_ref, b_ref, heads_ref):
    heads_ref[0] = _compute_heads(x_ref[0], w_ref[...], b_ref[...])  # (4, TP)


def _run_heads(x3, w, b, tile):
    bsz, c, hwp = x3.shape
    nt = hwp // tile
    return pl.pallas_call(
        _heads_kernel,
        out_shape=jax.ShapeDtypeStruct((bsz, 4, hwp), jnp.float32),
        grid=(bsz, nt),
        in_specs=[
            pl.BlockSpec((1, c, tile), lambda bi, ti: (bi, 0, ti)),
            pl.BlockSpec((4, c), lambda bi, ti: (0, 0)),
            pl.BlockSpec((4, 1), lambda bi, ti: (0, 0)),
        ],
        out_specs=pl.BlockSpec((1, 4, tile), lambda bi, ti: (bi, 0, ti)),
        compiler_params=pltpu.CompilerParams(
            dimension_semantics=("parallel", "parallel"),
            vmem_limit_bytes=_VMEM_LIMIT),
    )(x3, w, b)


# ----------------------------------------------------------------------------
# Kernel 2: fused forward + smooth-L1 (beta=1) per-head partial sums.
#   grid = (B, NC, NT): batch (parallel), pixel-chunk (parallel, for v7x
#   2-core splits at small B), pixel-tile within chunk (arbitrary, reduction).
#   Elementwise losses accumulate in a (4, tile) VMEM scratch; each (batch,
#   chunk) emits a (4, 1) partial sum at its last tile.
# ----------------------------------------------------------------------------
def _fused_loss_kernel(x_ref, w_ref, b_ref, y_ref, heads_ref, sums_ref, acc_ref,
                       *, hw_valid, hw_padded, tile, nt_inner):
    ci = pl.program_id(1)
    ti = pl.program_id(2)

    @pl.when(ti == 0)
    def _init():
        acc_ref[...] = jnp.zeros_like(acc_ref)

    heads = _compute_heads(x_ref[0], w_ref[...], b_ref[...])     # (4, TP)
    heads_ref[0] = heads                                         # one dense store

    d = heads - y_ref[0]                                         # (4, TP)
    ad = jnp.abs(d)
    per_elem = jnp.where(ad < 1.0, 0.5 * d * d, ad - 0.5)        # smooth-L1, beta=1

    if hw_padded != hw_valid:                                    # static (trace-time)
        pix = (ci * nt_inner + ti) * tile + jax.lax.broadcasted_iota(
            jnp.int32, per_elem.shape, 1)
        per_elem = jnp.where(pix < hw_valid, per_elem, 0.0)

    acc_ref[...] += per_elem

    @pl.when(ti == nt_inner - 1)
    def _fin():
        sums_ref[0, 0] = jnp.sum(acc_ref[...], axis=1, keepdims=True)   # (4, 1)


def _run_fused_loss(x3, w, b, y4, tile, hw_valid, hwp):
    bsz, c, _ = x3.shape
    nt = hwp // tile
    # Extra 'parallel' pixel-chunk axis: lets v7x split the pixel range across
    # its 2 TensorCores when the batch axis can't be split evenly.
    nc = 2 if (bsz % 2 == 1 and nt % 2 == 0) else 1
    nti = nt // nc

    pix_map = lambda bi, ci, ti: (bi, 0, ci * nti + ti)
    kernel = functools.partial(
        _fused_loss_kernel, hw_valid=hw_valid, hw_padded=hwp,
        tile=tile, nt_inner=nti)

    return pl.pallas_call(
        kernel,
        out_shape=(jax.ShapeDtypeStruct((bsz, 4, hwp), jnp.float32),
                   jax.ShapeDtypeStruct((bsz, nc, 4, 1), jnp.float32)),
        grid=(bsz, nc, nti),
        in_specs=[
            # If v5e profiling shows exposed DMA: pipeline_mode=pl.Buffered(3)
            # on the x / y4 specs.
            pl.BlockSpec((1, c, tile), pix_map),
            pl.BlockSpec((4, c), lambda bi, ci, ti: (0, 0)),
            pl.BlockSpec((4, 1), lambda bi, ci, ti: (0, 0)),
            pl.BlockSpec((1, 4, tile), pix_map),
        ],
        out_specs=(pl.BlockSpec((1, 4, tile), pix_map),
                   pl.BlockSpec((1, 1, 4, 1), lambda bi, ci, ti: (bi, ci, 0, 0))),
        scratch_shapes=[pltpu.VMEM((4, tile), jnp.float32)],
        compiler_params=pltpu.CompilerParams(
            dimension_semantics=("parallel", "parallel", "arbitrary"),
            vmem_limit_bytes=_VMEM_LIMIT),
    )(x3, w, b, y4)


# ----------------------------------------------------------------------------
# GraspModel in JAX
# ----------------------------------------------------------------------------
class GraspModelJAX:
    def __init__(self, in_channels, key, max_tile=_TP_TARGET):
        kw, kb = jax.random.split(key)
        self.in_channels = in_channels
        self.max_tile = max_tile
        # Deterministic 1x1-conv weights for the 4 heads (pos, cos, sin, width).
        self.w = jax.random.normal(kw, (4, in_channels), jnp.float32) * 0.1
        self.b = jax.random.normal(kb, (4, 1), jnp.float32) * 0.01

    # Contiguous reshape only; pad pixels only up to a multiple of 128.
    def _flatten_x(self, x_in):
        b, c, h, w = x_in.shape
        hw = h * w
        hwp = _round_up(hw, _LANE)
        x3 = x_in.reshape(b, c, hw)
        if hwp != hw:
            x3 = jnp.pad(x3, ((0, 0), (0, 0), (0, hwp - hw)))
        tile = _pick_tile(hwp, self.max_tile)
        return x3, tile, hw, hwp

    @staticmethod
    def _split_heads(heads, b, h, w, hw, hwp):
        if hwp != hw:
            heads = heads[:, :, :hw]
        heads4 = heads.reshape(b, 4, h, w)
        return (heads4[:, 0:1], heads4[:, 1:2], heads4[:, 2:3], heads4[:, 3:4])

    def forward(self, x_in):
        b, _, h, w = x_in.shape
        x3, tile, hw, hwp = self._flatten_x(x_in)
        heads = _run_heads(x3, self.w, self.b, tile)              # (B, 4, HWP)
        return self._split_heads(heads, b, h, w, hw, hwp)

    def __call__(self, x_in):
        return self.forward(x_in)

    def compute_loss(self, xc, yc):
        y_pos, y_cos, y_sin, y_width = yc
        b, _, h, w = xc.shape
        x3, tile, hw, hwp = self._flatten_x(xc)

        # Stack the 4 target maps into one (B, 4, HWP) array (single kernel
        # input, sublane-dense (4, tile) load per step).
        y4 = jnp.concatenate(
            [y_pos.reshape(b, 1, hw), y_cos.reshape(b, 1, hw),
             y_sin.reshape(b, 1, hw), y_width.reshape(b, 1, hw)], axis=1)
        if hwp != hw:
            y4 = jnp.pad(y4, ((0, 0), (0, 0), (0, hwp - hw)))

        heads, sums = _run_fused_loss(x3, self.w, self.b, y4, tile, hw, hwp)

        n = jnp.float32(b * hw)                                   # elements per head
        per_head = jnp.sum(sums[..., 0], axis=(0, 1)) / n         # (4,) mean losses
        p_loss, cos_loss, sin_loss, width_loss = (
            per_head[0], per_head[1], per_head[2], per_head[3])

        pos_pred, cos_pred, sin_pred, width_pred = self._split_heads(
            heads, b, h, w, hw, hwp)

        return {
            'loss': p_loss + cos_loss + sin_loss + width_loss,
            'losses': {
                'p_loss': p_loss,
                'cos_loss': cos_loss,
                'sin_loss': sin_loss,
                'width_loss': width_loss,
            },
            'pred': {
                'pos': pos_pred,
                'cos': cos_pred,
                'sin': sin_pred,
                'width': width_pred,
            },
        }

    def predict(self, xc):
        pos_pred, cos_pred, sin_pred, width_pred = self(xc)
        return {'pos': pos_pred, 'cos': cos_pred,
                'sin': sin_pred, 'width': width_pred}


# ----------------------------------------------------------------------------
# Pure-JAX reference for correctness spot-checks.
# ----------------------------------------------------------------------------
def _reference_preds(model, x):
    b, c, h, w = x.shape
    x3 = x.reshape(b, c, h * w)
    heads = jnp.einsum('kc,bcp->bkp', model.w, x3) + model.b[None, :, :]
    return [heads[:, k:k + 1, :].reshape(b, 1, h, w) for k in range(4)]


def _reference_loss(model, x, yc):
    preds = _reference_preds(model, x)

    def sl1(p, y):
        d = p - y
        ad = jnp.abs(d)
        return jnp.mean(jnp.where(ad < 1.0, 0.5 * d * d, ad - 0.5))

    losses = [sl1(p, y) for p, y in zip(preds, yc)]
    return losses[0] + losses[1] + losses[2] + losses[3], preds


def _make_inputs(key, b, c, h, w):
    k_x, k_pos, k_cos, k_sin, k_wid = jax.random.split(key, 5)
    x = jax.random.normal(k_x, (b, c, h, w), jnp.float32)
    yc = (jax.random.normal(k_pos, (b, 1, h, w), jnp.float32),
          jax.random.normal(k_cos, (b, 1, h, w), jnp.float32),
          jax.random.normal(k_sin, (b, 1, h, w), jnp.float32),
          jax.random.normal(k_wid, (b, 1, h, w), jnp.float32))
    return x, yc


def _check(model, x, yc, tol=1e-3):
    out = model.compute_loss(x, yc)
    preds = model.predict(x)
    jax.block_until_ready(out['loss'])
    jax.block_until_ready(preds['pos'])
    ref_loss, ref_preds = _reference_loss(model, x, yc)
    assert out['loss'].shape == ()
    assert preds['pos'].shape == x.shape[:1] + (1,) + x.shape[2:]
    assert abs(float(out['loss']) - float(ref_loss)) < tol
    assert float(jnp.max(jnp.abs(preds['pos'] - ref_preds[0]))) < tol
    assert float(jnp.max(jnp.abs(out['pred']['width'] - ref_preds[3]))) < tol
    return out, preds


if __name__ == "__main__":
    key = jax.random.PRNGKey(0)
    k_model, k_in1, k_in2, k_in3 = jax.random.split(key, 4)

    B, C, H, W = 2, 4, 16, 16
    model = GraspModelJAX(in_channels=C, key=k_model)

    # Primary check: aligned pixel count (no padding, single tile).
    x, yc = _make_inputs(k_in1, B, C, H, W)
    out, preds = _check(model, x, yc)
    assert preds['width'].shape == (B, 1, H, W)

    # Secondary checks (tiny forced tile): exercise the lane-padding mask and
    # the parallel pixel-chunk / multi-tile accumulation paths.
    model_small = GraspModelJAX(in_channels=C, key=k_model, max_tile=128)
    x2, yc2 = _make_inputs(k_in2, 1, C, 12, 11)    # hw=132 -> pad to 256, nc=2
    _check(model_small, x2, yc2)
    x3, yc3 = _make_inputs(k_in3, 1, C, 16, 32)    # hw=512, nc=2, 2 tiles/chunk
    _check(model_small, x3, yc3)

    print("KERNEL_OK")
</pallas_src>

<mosaic_0001>
module attributes {stable_mosaic.version = 11 : i64} {
  func.func @_fused_loss_kernel(%arg0: i32, %arg1: i32, %arg2: i32, %arg3: memref<1x4x256xf32, #tpu.memory_space<vmem>>, %arg4: memref<4x4xf32, #tpu.memory_space<vmem>>, %arg5: memref<4x1xf32, #tpu.memory_space<vmem>>, %arg6: memref<1x4x256xf32, #tpu.memory_space<vmem>>, %arg7: memref<1x4x256xf32, #tpu.memory_space<vmem>>, %arg8: memref<1x1x4x1xf32, #tpu.memory_space<vmem>>, %arg9: memref<4x256xf32, #tpu.memory_space<vmem>>) attributes {dimension_semantics = [#tpu.dimension_semantics<parallel>, #tpu.dimension_semantics<parallel>, #tpu.dimension_semantics<arbitrary>], iteration_bounds = array<i64: 2, 1, 1>, scalar_prefetch = 0 : i64, scratch_operands = 1 : i64, tpu.core_type = #tpu.core_type<tc>, window_params = [{transform_indices = @transform_0, window_bounds = array<i64: 1, 4, 256>}, {pipeline_mode = #tpu.pipeline_mode<synchronous>, transform_indices = @transform_1, window_bounds = array<i64: 4, 4>}, {pipeline_mode = #tpu.pipeline_mode<synchronous>, transform_indices = @transform_2, window_bounds = array<i64: 4, 1>}, {transform_indices = @transform_3, window_bounds = array<i64: 1, 4, 256>}, {transform_indices = @transform_4, window_bounds = array<i64: 1, 4, 256>}, {transform_indices = @transform_5, window_bounds = array<i64: 1, 1, 4, 1>}]} {
    %c0_i32 = arith.constant 0 : i32
    %0 = arith.cmpi eq, %arg2, %c0_i32 : i32
    %1 = arith.extui %0 : i1 to i32
    %c0_i32_0 = arith.constant 0 : i32
    %2 = arith.cmpi ne, %1, %c0_i32_0 : i32
    scf.if %2 {
      %cst_21 = arith.constant 0.000000e+00 : f32
      %53 = vector.broadcast %cst_21 : f32 to vector<4x256xf32>
      %c0_22 = arith.constant 0 : index
      %c0_23 = arith.constant 0 : index
      %54 = vector.load %arg9[%c0_22, %c0_23] : memref<4x256xf32, #tpu.memory_space<vmem>>, vector<4x256xf32>
      tpu.vector_store %arg9[%c0_22, %c0_23], %53 {strides = array<i32>} : memref<4x256xf32, #tpu.memory_space<vmem>>, vector<4x256xf32>,
    } else {
    }
    %c0 = arith.constant 0 : index
    %c0_1 = arith.constant 0 : index
    %c0_2 = arith.constant 0 : index
    %3 = vector.load %arg3[%c0, %c0_1, %c0_2] : memref<1x4x256xf32, #tpu.memory_space<vmem>>, vector<1x4x256xf32>
    %4 = vector.shape_cast %3 : vector<1x4x256xf32> to vector<4x256xf32>
    %c0_3 = arith.constant 0 : index
    %c0_4 = arith.constant 0 : index
    %5 = vector.load %arg4[%c0_3, %c0_4] : memref<4x4xf32, #tpu.memory_space<vmem>>, vector<4x4xf32>
    %c0_5 = arith.constant 0 : index
    %c0_6 = arith.constant 0 : index
    %6 = vector.load %arg5[%c0_5, %c0_6] : memref<4x1xf32, #tpu.memory_space<vmem>>, vector<4x1xf32>
    %7 = vector.extract_strided_slice %5 {offsets = [0, 0], sizes = [4, 1], strides = [1, 1]} : vector<4x4xf32> to vector<4x1xf32>
    %8 = vector.extract_strided_slice %4 {offsets = [0, 0], sizes = [1, 256], strides = [1, 1]} : vector<4x256xf32> to vector<1x256xf32>
    %9 = vector.broadcast %7 : vector<4x1xf32> to vector<4x256xf32>
    %10 = vector.broadcast %8 : vector<1x256xf32> to vector<4x256xf32>
    %11 = arith.mulf %9, %10 : vector<4x256xf32>
    %12 = vector.extract_strided_slice %5 {offsets = [0, 1], sizes = [4, 1], strides = [1, 1]} : vector<4x4xf32> to vector<4x1xf32>
    %13 = vector.extract_strided_slice %4 {offsets = [1, 0], sizes = [1, 256], strides = [1, 1]} : vector<4x256xf32> to vector<1x256xf32>
    %14 = vector.broadcast %12 : vector<4x1xf32> to vector<4x256xf32>
    %15 = vector.broadcast %13 : vector<1x256xf32> to vector<4x256xf32>
    %16 = arith.mulf %14, %15 : vector<4x256xf32>
    %17 = vector.extract_strided_slice %5 {offsets = [0, 2], sizes = [4, 1], strides = [1, 1]} : vector<4x4xf32> to vector<4x1xf32>
    %18 = vector.extract_strided_slice %4 {offsets = [2, 0], sizes = [1, 256], strides = [1, 1]} : vector<4x256xf32> to vector<1x256xf32>
    %19 = vector.broadcast %17 : vector<4x1xf32> to vector<4x256xf32>
    %20 = vector.broadcast %18 : vector<1x256xf32> to vector<4x256xf32>
    %21 = arith.mulf %19, %20 : vector<4x256xf32>
    %22 = arith.addf %11, %21 : vector<4x256xf32>
    %23 = vector.extract_strided_slice %5 {offsets = [0, 3], sizes = [4, 1], strides = [1, 1]} : vector<4x4xf32> to vector<4x1xf32>
    %24 = vector.extract_strided_slice %4 {offsets = [3, 0], sizes = [1, 256], strides = [1, 1]} : vector<4x256xf32> to vector<1x256xf32>
    %25 = vector.broadcast %23 : vector<4x1xf32> to vector<4x256xf32>
    %26 = vector.broadcast %24 : vector<1x256xf32> to vector<4x256xf32>
    %27 = arith.mulf %25, %26 : vector<4x256xf32>
    %28 = arith.addf %16, %27 : vector<4x256xf32>
    %29 = arith.addf %22, %28 : vector<4x256xf32>
    %30 = vector.broadcast %6 : vector<4x1xf32> to vector<4x256xf32>
    %31 = arith.addf %29, %30 : vector<4x256xf32>
    %c0_7 = arith.constant 0 : index
    %c0_8 = arith.constant 0 : index
    %c0_9 = arith.constant 0 : index
    %32 = vector.load %arg7[%c0_7, %c0_8, %c0_9] : memref<1x4x256xf32, #tpu.memory_space<vmem>>, vector<1x4x256xf32>
    %33 = vector.shape_cast %32 : vector<1x4x256xf32> to vector<4x256xf32>
    %34 = vector.shape_cast %31 : vector<4x256xf32> to vector<1x4x256xf32>
    tpu.vector_store %arg7[%c0_7, %c0_8, %c0_9], %34 {strides = array<i32>} : memref<1x4x256xf32, #tpu.memory_space<vmem>>, vector<1x4x256xf32>,
    %c0_10 = arith.constant 0 : index
    %c0_11 = arith.constant 0 : index
    %c0_12 = arith.constant 0 : index
    %35 = vector.load %arg6[%c0_10, %c0_11, %c0_12] : memref<1x4x256xf32, #tpu.memory_space<vmem>>, vector<1x4x256xf32>
    %36 = vector.shape_cast %35 : vector<1x4x256xf32> to vector<4x256xf32>
    %37 = arith.subf %31, %36 : vector<4x256xf32>
    %38 = math.absf %37 : vector<4x256xf32>
    %cst = arith.constant 1.000000e+00 : f32
    %39 = vector.broadcast %cst : f32 to vector<4x256xf32>
    %40 = arith.cmpf olt, %38, %39 : vector<4x256xf32>
    %cst_13 = arith.constant 5.000000e-01 : f32
    %41 = vector.broadcast %cst_13 : f32 to vector<4x256xf32>
    %42 = arith.mulf %41, %37 : vector<4x256xf32>
    %43 = arith.mulf %42, %37 : vector<4x256xf32>
    %cst_14 = arith.constant 5.000000e-01 : f32
    %44 = vector.broadcast %cst_14 : f32 to vector<4x256xf32>
    %45 = arith.subf %38, %44 : vector<4x256xf32>
    %46 = arith.select %40, %43, %45 : vector<4x256xi1>, vector<4x256xf32>
    %c0_15 = arith.constant 0 : index
    %c0_16 = arith.constant 0 : index
    %47 = vector.load %arg9[%c0_15, %c0_16] : memref<4x256xf32, #tpu.memory_space<vmem>>, vector<4x256xf32>
    %48 = arith.addf %47, %46 : vector<4x256xf32>
    %c0_17 = arith.constant 0 : index
    %c0_18 = arith.constant 0 : index
    %49 = vector.load %arg9[%c0_17, %c0_18] : memref<4x256xf32, #tpu.memory_space<vmem>>, vector<4x256xf32>
    tpu.vector_store %arg9[%c0_17, %c0_18], %48 {strides = array<i32>} : memref<4x256xf32, #tpu.memory_space<vmem>>, vector<4x256xf32>,
    %c0_i32_19 = arith.constant 0 : i32
    %50 = arith.cmpi eq, %arg2, %c0_i32_19 : i32
    %51 = arith.extui %50 : i1 to i32
    %c0_i32_20 = arith.constant 0 : i32
    %52 = arith.cmpi ne, %51, %c0_i32_20 : i32
    scf.if %52 {
      %c0_21 = arith.constant 0 : index
      %c0_22 = arith.constant 0 : index
      %53 = vector.load %arg9[%c0_21, %c0_22] : memref<4x256xf32, #tpu.memory_space<vmem>>, vector<4x256xf32>
      %cst_23 = arith.constant dense<0.000000e+00> : vector<4xf32>
      %54 = vector.multi_reduction <add>, %53, %cst_23 [1] : vector<4x256xf32> to vector<4xf32>
      %55 = vector.shape_cast %54 : vector<4xf32> to vector<4x1xf32>
      %c0_24 = arith.constant 0 : index
      %c0_25 = arith.constant 0 : index
      %c0_26 = arith.constant 0 : index
      %c0_27 = arith.constant 0 : index
      %56 = vector.load %arg8[%c0_24, %c0_25, %c0_26, %c0_27] : memref<1x1x4x1xf32, #tpu.memory_space<vmem>>, vector<1x1x4x1xf32>
      %57 = vector.shape_cast %56 : vector<1x1x4x1xf32> to vector<4x1xf32>
      %58 = vector.shape_cast %55 : vector<4x1xf32> to vector<1x1x4x1xf32>
      tpu.vector_store %arg8[%c0_24, %c0_25, %c0_26, %c0_27], %58 {strides = array<i32>} : memref<1x1x4x1xf32, #tpu.memory_space<vmem>>, vector<1x1x4x1xf32>,
    } else {
    }
    return
  }
  func.func @transform_0(%arg0: i32, %arg1: i32, %arg2: i32) -> (i32, i32, i32) {
    %c1_i32 = arith.constant 1 : i32
    %0 = arith.muli %arg1, %c1_i32 : i32
    %1 = arith.addi %0, %arg2 : i32
    %c0_i32 = arith.constant 0 : i32
    %c0_i32_0 = arith.constant 0 : i32
    return %arg0, %c0_i32, %1 : i32, i32, i32
  }
  func.func @transform_1(%arg0: i32, %arg1: i32, %arg2: i32) -> (i32, i32) {
    %c0_i32 = arith.constant 0 : i32
    %c0_i32_0 = arith.constant 0 : i32
    %c0_i32_1 = arith.constant 0 : i32
    return %c0_i32, %c0_i32_0 : i32, i32
  }
  func.func @transform_2(%arg0: i32, %arg1: i32, %arg2: i32) -> (i32, i32) {
    %c0_i32 = arith.constant 0 : i32
    %c0_i32_0 = arith.constant 0 : i32
    %c0_i32_1 = arith.constant 0 : i32
    return %c0_i32, %c0_i32_0 : i32, i32
  }
  func.func @transform_3(%arg0: i32, %arg1: i32, %arg2: i32) -> (i32, i32, i32) {
    %c1_i32 = arith.constant 1 : i32
    %0 = arith.muli %arg1, %c1_i32 : i32
    %1 = arith.addi %0, %arg2 : i32
    %c0_i32 = arith.constant 0 : i32
    %c0_i32_0 = arith.constant 0 : i32
    return %arg0, %c0_i32, %1 : i32, i32, i32
  }
  func.func @transform_4(%arg0: i32, %arg1: i32, %arg2: i32) -> (i32, i32, i32) {
    %c1_i32 = arith.constant 1 : i32
    %0 = arith.muli %arg1, %c1_i32 : i32
    %1 = arith.addi %0, %arg2 : i32
    %c0_i32 = arith.constant 0 : i32
    %c0_i32_0 = arith.constant 0 : i32
    return %arg0, %c0_i32, %1 : i32, i32, i32
  }
  func.func @transform_5(%arg0: i32, %arg1: i32, %arg2: i32) -> (i32, i32, i32, i32) {
    %c0_i32 = arith.constant 0 : i32
    %c0_i32_0 = arith.constant 0 : i32
    %c0_i32_1 = arith.constant 0 : i32
    return %arg0, %arg1, %c0_i32, %c0_i32_0 : i32, i32, i32, i32
  }
}

</mosaic_0001>

<bundles_post_ra>
// kernel: tpu_custom_call.1
= control target key start
LH: loop header
LB: loop body
LE: loop exit
PB: predicated region body
PF: predicated region fallthrough
CT: control target
= control target key end

     0   :  { %11 = vsyncpa [#allocation4], 0  ;;  %s1078_s0 = inlined_call_operand.hbm [shape: f32[2,4,256], index: 0, kind: input, shape index: {}]   ;;  %s1079_s1 = inlined_call_operand.vmem [shape: f32[4,4], index: 1, kind: input, shape index: {}]   ;;  %s1080_s2 = inlined_call_operand.vmem [shape: f32[4,1], index: 2, kind: input, shape index: {}]   ;;  %s1081_s3 = inlined_call_operand.hbm [shape: f32[2,4,256], index: 3, kind: input, shape index: {}]   ;;  %s1082_s4 = inlined_call_operand.hbm [shape: f32[2,4,256], index: 4, kind: output, shape index: {0}]   ;;  %s1083_s5 = inlined_call_operand.vmem [shape: f32[2,1,4,1], index: 5, kind: output, shape index: {1}]  }
   0x1   :  { %13 = vsyncpa [#allocation4 + $0x1], 0 }
   0x2   :  { %14 = vsyncpa [#allocation7], 0 }
   0x3   :  { %16 = vsyncpa [#allocation7 + $0x1], 0 }
   0x4   :  { %17 = vsyncpa [#allocation5], 0 }
   0x5   :  { %19 = vsyncpa [#allocation5 + $0x1], 0  ;;  %s930_s18 = smov 0   ;;  %s932_s19 = smov 0  }
   0x6   :  { %s934_s20 = smov 0   ;;  %s936_s21 = smov 0  }
   0x7   :  { %s938_s22 = smov 0   ;;  %s940_s23 = smov 0  }
   0x8 LB: > { %1086 = sst [smem:[#allocation12_spill]] %s890_s22  ;;  %s646_s24 = sadd.s32 4294967295, %s894_s23   ;;  %s894_s23 = sphi %s940_s23, %s25_s23   ;;  %s890_s22 = sphi %s938_s22, %s1093_s22   ;;  %s886_s21 = sphi %s936_s21, %s1092_s21   ;;  %s882_s20 = sphi %s934_s20, %s1096_s20   ;;  %s878_s19 = sphi %s932_s19, %s1095_s19   ;;  %s874_s18 = sphi %s930_s18, %s1094_s18  }
   0x9   : > { %s647_s25 = sadd.s32 4294967294, %s894_s23   ;;  %s44_s26 = sadd.s32 1, %s890_s22 }
   0xa   : > { %s55_s27 = sadd.s32 1, %s882_s20  ;;  %p46_p0 = scmp.ge.s32.totalorder %s44_s26, 2 }
   0xb   : > { %p62_p1 = scmp.ne.s32.totalorder %s882_s20, %s878_s19  ;;  %p63_p2 = scmp.eq.s32.totalorder %s894_s23, 0 }
   0xc   : > { %p68_p3 = scmp.ne.s32.totalorder %s878_s19, %s874_s18  ;;  %s1098_s26 = smov (%p46_p0, %s44_s26), 0 }
   0xd   : > { %1087 = sst [smem:[#allocation13_spill]] %s1098_s26  ;;  %p971_p4 = por %p63_p2, %p62_p1 }
   0xe   : > { %p69_p5 = scmp.eq.s32.totalorder %s646_s24, 0  ;;  %s50_s29 = ssub.s32 %s890_s22, %s1098_s26 }
   0xf   : > { %p168_p6 = scmp.eq.s32.totalorder %s646_s24, 1  ;;  %p53_p7 = scmp.eq.s32.totalorder %s50_s29, 0 }
  0x10   : > { %p977_p8 = por %p69_p5, %p68_p3  ;;  %p174_p10 = scmp.eq.s32.totalorder %s647_s25, 1 }
  0x11   : > { %p981_p9 = por %p168_p6, %p62_p1  ;;  %p649_p12 = scmp.ge.s32.totalorder %s894_s23, 2 }
  0x12   : > { %s986_s7 = scalar_select %p53_p7, %s882_s20, %s55_s27  }
  0x13   : > { %p988_p11 = por %p174_p10, %p68_p3  ;;  %p688_p13 = scmp.lt.s32.totalorder %s894_s23, 2 }
  0x14   : > { %s228_s9 = sand.u32 1, %s882_s20   ;;  %s668_s11 = sshll.u32 %s890_s22, 3 }
  0x15   : > { %s650_s10 = sshll.u32 %s228_s9, 3  ;;  %s240_s14 = scalar_lea.hbm %s1078_s0, %s668_s11 }
  0x16   : > { %s232_s15 = scalar_lea.vmem [#allocation3], %s650_s10  ;;  %s242_s17 = sshll.u32 %s240_s14, 4  ;;  %s243_s17 = int_to_ptr.hbm [resolvable:$true] %s242_s17 }
  0x17   : > { %s244_s16 = sshll.u32 %s232_s15, 4  ;;  %p678_p0 = pnand %p688_p13, %p971_p4  ;;  %s245_s16 = int_to_ptr.vmem [resolvable:$true] %s244_s16 }
  0x18   : > { %p656_p1 = scmp.ge.s32.totalorder %s894_s23, 1  ;;  %p272_p2 = scmp.lt.s32.totalorder %s894_s23, 3 }
  0x19   : > { %s229_s24 = scalar_lea.sflag [#allocation4], %s228_s9  ;;  %s263_s29 = scalar_lea.hbm %s1081_s3, %s668_s11 }
  0x1a   : > { %680 = dma.hbm_to_vmem [thread:$0]  (!%p678_p0), %s243_s17, 128, %s245_s16, %s229_s24  }
  0x1b   : > { %p273_p3 = pnand %p656_p1, %p272_p2  ;;  %s255_s26 = scalar_lea.vmem [#allocation6], %s650_s10 }
  0x1c   : > { %s267_s22 = sshll.u32 %s255_s26, 4  ;;  %s265_s12 = sshll.u32 %s263_s29, 4  ;;  %s268_s22 = int_to_ptr.vmem [resolvable:$true] %s267_s22  ;;  %s266_s12 = int_to_ptr.hbm [resolvable:$true] %s265_s12 }
  0x1d   : > { %s252_s13 = scalar_lea.sflag [#allocation7], %s228_s9  ;;  %276 = sbr.rel (%p273_p3) target bundleno = 311 (0x137), region = 36 }
  0x1e   : > { %683 = dma.hbm_to_vmem [thread:$0]  (!%p678_p0), %s266_s12, 128, %s268_s22, %s252_s13  }
  0x1f   : > { %s1007_s28 = sand.u32 (!%p273_p3), 1, %s878_s19  }
  0x20   : > { %s1010_s14 = sshll.u32 (!%p273_p3), %s1007_s28, 3  ;;  %s279_s15 = scalar_lea.sflag (!%p273_p3), [#allocation4], %s1007_s28 }
  0x21   : > { %s282_s16 = scalar_lea.vmem (!%p273_p3), [#allocation3], %s1010_s14 }
  0x22   : > { %861 = dma.done.wait (%p977_p8), %s279_s15, 128  }
  0x23   : > { %863 = vsyncadd (%p977_p8), %s279_s15, 4294967168  ;;  %s289_s22 = scalar_lea.sflag [#allocation7], %s1007_s28  ;;  %s292_s26 = scalar_lea.vmem [#allocation6], %s1010_s14 }
  0x24   : > { %865 = dma.done.wait (%p977_p8), %s289_s22, 128  }
  0x25   : > { %867 = vsyncadd (%p977_p8), %s289_s22, 4294967168  ;;  %v896_v0 = vmov 2   ;;  %v897_v1 = vmov 0   ;;  %v351_v2 = vld [vmem:[%s1079_s1] sm:$0xf]  ;;  %v898_v4 = vmov 3  }
  0x26   : > { %744 = vset.pattern.permute.xlu1 %v896_v0  ;;  %742 = vset.pattern.permute.xlu0 %v897_v1  ;;  %v352_v3 = vld [vmem:[%s1080_s2] sm:$0xf]  ;;  %v899_v5 = vmov 1   ;;  %v350_v7 = vld [vmem:[%s282_s16] sm:$0xff]  ;;  %vm419_vm0 = vcmask 1043456   ;;  %s322_s30 = scalar_lea.vmem [#allocation8], %s1010_s14 }
  0x27   : > { %746 = vset.pattern.permute.xlu2 %v897_v1  ;;  %380 = vperm.xlu1 %744, %v351_v2   ;;  %v423_v6 = vld [vmem:[%s292_s26] sm:$0xff]  ;;  %v383_v9 = vperm.slane %v350_v7, 2  ;;  %v384_v10 = vperm.slane %v350_v7, 6  ;;  %v359_v12 = vperm.slane %v350_v7, 0  ;;  %v360_v13 = vperm.slane %v350_v7, 4  ;;  %s670_s24 = sshll.u32 %s886_s21, 3 }
  0x28   : > { %355 = vperm.xlu0 %742, %v351_v2   ;;  %411 = vperm.xlu2 %746, %v352_v3   ;;  %425 = vst [vmem:[#allocation1] ss:$2 sm:$0xff] %v423_v6  ;;  %v397_v14 = vperm.slane %v350_v7, 3  ;;  %v398_v15 = vperm.slane %v350_v7, 7  ;;  %v371_v16 = vperm.slane %v350_v7, 1  ;;  %v372_v17 = vperm.slane %v350_v7, 5  ;;  %s491_s29 = scalar_lea.hbm %s1082_s4, %s670_s24 }
  0x29   : > { %v387_v18 = vperm.slane %v383_v9, 2  ;;  %v388_v19 = vperm.slane %v384_v10, 2  ;;  %v363_v20 = vperm.slane %v359_v12, 0  ;;  %v364_v21 = vperm.slane %v360_v13, 0  ;;  %s493_s12 = sshll.u32 %s322_s30, 4  ;;  %s495_s13 = sshll.u32 %s491_s29, 4  ;;  %s494_s12 = int_to_ptr.vmem [resolvable:$true] %s493_s12  ;;  %s496_s13 = int_to_ptr.hbm [resolvable:$true] %s495_s13 }
  0x2a   : > { %v401_v22 = vperm.slane %v397_v14, 3  ;;  %v402_v23 = vperm.slane %v398_v15, 3  ;;  %v375_v24 = vperm.slane %v371_v16, 1  ;;  %v376_v25 = vperm.slane %v372_v17, 1  ;;  %s470_s14 = scalar_lea.sflag [#allocation5], %s1007_s28  ;;  %s822_s15 = sshra.s32 %s496_s13, 4  ;;  %s823_s15 = int_to_ptr.hbm [resolvable:$true] %s822_s15 }
  0x2b   : > { %s824_s16 = scalar_lea.hbm %s823_s15, 8  ;;  %s828_s9 = scalar_lea.hbm %s1082_s4, 16 }
  0x2c   : > { %p825_p4 = scmp.ne.s32.totalorder %s823_s15, %s824_s16  ;;  %p829_p7 = scmp.lt.s32.totalorder %s823_s15, %s1082_s4 }
  0x2d   : > { %p830_p8 = scmp.lt.s32.totalorder %s828_s9, %s824_s16 }
  0x2e   : > { %p826_p5 = pnand %p825_p4, %p981_p9 }
  0x2f   : > { %745 = vset.pattern.permute.xlu1 %v898_v4  ;;  %v426_v43 = vld.sshfl [vmem:[#allocation1] sm:$0xff pattern:$0x75316420]  ;;  %v427_v44 = vld.sshfl [vmem:[#allocation1 + $0x8] sm:$0xff pattern:$0x75316420]  ;;  %p831_p10 = por %p830_p8, %p829_p7 }
  0x30   : > { %743 = vset.pattern.permute.xlu0 %v899_v5  ;;  %394 = vperm.xlu1 %745, %v351_v2   ;;  %p827_p6 = pneg %p826_p5 }
  0x31   : > { %368 = vperm.xlu0 %743, %v351_v2  }
  0x32   : > { %p832_p13 = pnand %p831_p10, %p827_p6 }
  0x39   : > { %747 = vset.pattern.permute.xlu0 %v897_v1 }
  0x82   : > { %v412_v40 = vpop.permute.xlu2 %411 }
  0x99   : > { %v381_v8 = vpop.permute.xlu1 %380 }
  0x9a   : > { %v356_v11 = vpop.permute.xlu0 %355  ;;  %v389_v26 = vmul.f32 %v387_v18, %v381_v8  ;;  %v390_v27 = vmul.f32 %v388_v19, %v381_v8 }
  0x9b   : > { %v365_v28 = vmul.f32 %v363_v20, %v356_v11  ;;  %v366_v29 = vmul.f32 %v364_v21, %v356_v11 }
  0x9d   : > { %v391_v36 = vadd.f32 %v389_v26, %v365_v28  ;;  %v392_v37 = vadd.f32 %v390_v27, %v366_v29 }
  0xa2   : > { %v395_v30 = vpop.permute.xlu1 %394 }
  0xa3   : > { %v369_v31 = vpop.permute.xlu0 %368  ;;  %v403_v32 = vmul.f32 %v401_v22, %v395_v30  ;;  %v404_v33 = vmul.f32 %v402_v23, %v395_v30 }
  0xa4   : > { %v377_v34 = vmul.f32 %v375_v24, %v369_v31  ;;  %v378_v35 = vmul.f32 %v376_v25, %v369_v31 }
  0xa6   : > { %v405_v38 = vadd.f32 %v403_v32, %v377_v34  ;;  %v406_v39 = vadd.f32 %v404_v33, %v378_v35 }
  0xa8   : > { %v407_v41 = vadd.f32 %v405_v38, %v391_v36  ;;  %v408_v42 = vadd.f32 %v406_v39, %v392_v37 }
  0xaa   : > { %v414_v45 = vadd.f32 %v412_v40, %v407_v41  ;;  %v415_v46 = vadd.f32 %v412_v40, %v408_v42 }
  0xac   : > { %v418_v47 = vrot.slane %v415_v46, 4  ;;  %v430_v48 = vsub.f32 %v414_v45, %v426_v43  ;;  %v431_v49 = vsub.f32 %v415_v46, %v427_v44 }
  0xae   : > { %v420_v50 = vsel %vm419_vm0, %v414_v45, %v418_v47  ;;  %v432_v51 = vand.u32 2147483647, %v430_v48  ;;  %v433_v52 = vand.u32 2147483647, %v431_v49  ;;  %v436_v53 = vmul.f32 0.5, %v430_v48 }
  0xaf   : > { %v437_v54 = vmul.f32 0.5, %v431_v49  ;;  %422 = vst [vmem:[%s322_s30] sm:$0xff] %v420_v50 }
  0xb0   : > { %vm435_vm1 = vcmp.lt.f32.partialorder %v433_v52, 1.0  ;;  %v438_v55 = vmul.f32 %v436_v53, %v430_v48  ;;  %v661_v57 = vadd.f32 -0.5, %v432_v51  ;;  %v662_v58 = vadd.f32 -0.5, %v433_v52 }
  0xb1   : > { %v439_v56 = vmul.f32 %v437_v54, %v431_v49  ;;  %vm434_vm2 = vcmp.lt.f32.partialorder %v432_v51, 1.0 }
  0xb2   : > { %v442_v61 = vsel %vm434_vm2, %v438_v55, %v661_v57 }
  0xb3   : > { %v443_v59 = vsel %vm435_vm1, %v439_v56, %v662_v58 }
  0xb4   : > { %v447_v60 = vrot.slane %v443_v59, 4 }
  0xb6   : > { %v448_v62 = vsel %vm419_vm0, %v442_v61, %v447_v60 }
  0xb7   : > { %457 = vst [vmem:[#allocation1] ss:$2 sm:$0xff] %v448_v62 }
  0xb8   : > { %835 = shalt.err (!%p832_p13)
}
  0xb9   : > { %675 = dma.vmem_to_hbm [thread:$0]  (%p981_p9), %s494_s12, 128, %s496_s13, %s470_s14   ;;  %vm467_vm3 = vcmask 3072  }
  0xba   : > { %p338_p0 = scmp.lt.s32.totalorder %s886_s21, 1 }
  0xbc   : > { %s1100_s21 = smov (!%p338_p0, %s886_s21), 1 }
  0xbd   : > { %s660_s28 = sshll.u32 %s1100_s21, 2 }
  0xbe   : > { %v458_v63 = vld.sshfl [vmem:[#allocation1] sm:$0xff pattern:$0x75316420]  ;;  %v459_v0 = vld.sshfl [vmem:[#allocation1 + $0x8] sm:$0xff pattern:$0x75316420]  ;;  %s344_s24 = scalar_lea.vmem %s1083_s5, %s660_s28 }
  0xbf   : > { %v462_v1 = vsel %vm419_vm0, %v458_v63, 0.0  ;;  %v463_v2 = vsel %vm419_vm0, %v459_v0, 0.0 }
  0xc0   : > { %v464_v3 = vadd.f32 %v463_v2, %v462_v1 }
  0xc2   : > { %465 = vadd.xlane.f32.xlu2 %v464_v3 }
 0x135   : > { %v466_v4 = vpop.xlane.xlu2 %465 }
 0x136   : > { %468 = vst.msk [vmem:[%s344_s24] sm:$0xf] %vm467_vm3, %v466_v4 }
 0x137 PF: > { %s510_s6 = sand.u32 1, %s874_s18   ;;  %p685_p9 = pnand %p649_p12, %p988_p11 }
 0x138   : > { %s511_s25 = scalar_lea.sflag [#allocation5], %s510_s6 }
 0x139   : > { %p686_p1 = pneg %p685_p9 }
 0x13b   : > { %869 = dma.done.wait (%p686_p1), %s511_s25, 128  }
 0x13c   : > { %871 = vsyncadd (%p686_p1), %s511_s25, 4294967168  ;;  %s25_s23 = sadd.s32 1, %s894_s23   ;;  %s1092_s21 = sld [smem:[#allocation12_spill]] }
 0x13d   : > { %p22_p2 = scmp.ge.s32.totalorder %s25_s23, 4   ;;  %s1093_s22 = sld [smem:[#allocation13_spill]] }
 0x13e   : > { %s1094_s18 = smov %s878_s19  ;;  %s1095_s19 = smov %s882_s20 }
 0x13f   : > { %s1096_s20 = smov %s986_s7  ;;  %24 = sbr.rel (!%p22_p2) target bundleno = 8 (0x8), region = 114 }
 0x144   :  { %527 = vsyncpa [#allocation4], 1 }
 0x145   :  { %529 = vsyncpa [#allocation4 + $0x1], 1 }
 0x146   :  { %530 = vsyncpa [#allocation7], 1 }
 0x147   :  { %532 = vsyncpa [#allocation7 + $0x1], 1 }
 0x148   :  { %533 = vsyncpa [#allocation5], 1 }
 0x149   :  { %535 = vsyncpa [#allocation5 + $0x1], 1 }

</bundles_post_ra>
